<compile_context>
chip_gen: v7x
topology: tpu7x:2x2x1
jax: 0.10.0
libtpu: 0.0.40
codegen_flags: <defaults>
</compile_context>

<pallas_src>
import jax
import jax.numpy as jnp
from jax.experimental import pallas as pl
from jax.experimental.pallas import tpu as pltpu


# ----------------------------- Pallas kernel ------------------------------- #

def _make_dcrnn_kernel(num_layer, K, hidden_dim, fin_pads, layout):
    """Builds the fused multi-layer DCGRU kernel (static unroll over layers).

    fin_pads : per-layer (padded) input feature width.
    layout   : per-layer dict of row offsets into the packed weight slab:
               'x'   -> list of X-side block starts   (fin_pads[l] rows each)
               'hzr' -> list of H-side Z/R block starts (Hd rows each)
               'hc'  -> list of H-side candidate block starts (Hd rows each)
               'bias'-> row of the fused [bR | bZ | bH] bias
               Block lists are ordered [k=0 (dirs pre-summed), (f,1),(b,1),
               (f,2),(b,2), ...].
    """
    Hd = hidden_dim
    W3 = 3 * Hd

    def kernel(x_ref, h0_ref, p_ref, w_ref, out_ref):
        N = x_ref.shape[0]
        Pf = p_ref[0].astype(jnp.float32)      # (N, N) forward diffusion
        Pb = p_ref[1].astype(jnp.float32)      # (N, N) backward diffusion
        if K > 2:
            # Fold the Chebyshev 2x factor into the operator once.
            Pf2 = Pf + Pf
            Pb2 = Pb + Pb
        else:
            Pf2 = Pb2 = None

        def wblk(start, rows):
            # Static row slice of the packed weight slab, always full 3*Hd wide.
            return w_ref[start:start + rows, :]

        def dconv_acc(acc, C, starts, rows):
            """acc (+)= sum_{d,k} T_k(P_d) @ C @ W[d,k]  (sum-of-dots form)."""
            t = jnp.dot(C, wblk(starts[0], rows),
                        preferred_element_type=jnp.float32)
            acc = t if acc is None else acc + t
            if K > 1:
                tf1 = jnp.dot(Pf, C, preferred_element_type=jnp.float32)
                tb1 = jnp.dot(Pb, C, preferred_element_type=jnp.float32)
                acc = (acc
                       + jnp.dot(tf1, wblk(starts[1], rows),
                                 preferred_element_type=jnp.float32)
                       + jnp.dot(tb1, wblk(starts[2], rows),
                                 preferred_element_type=jnp.float32))
                tf0 = tb0 = C
                for k in range(2, K):          # static unroll over diffusion order
                    tf2 = jnp.dot(Pf2, tf1, preferred_element_type=jnp.float32) - tf0
                    tb2 = jnp.dot(Pb2, tb1, preferred_element_type=jnp.float32) - tb0
                    acc = (acc
                           + jnp.dot(tf2, wblk(starts[2 * k - 1], rows),
                                     preferred_element_type=jnp.float32)
                           + jnp.dot(tb2, wblk(starts[2 * k], rows),
                                     preferred_element_type=jnp.float32))
                    tf0, tf1 = tf1, tf2
                    tb0, tb1 = tb1, tb2
            return acc

        cur = x_ref[...].astype(jnp.float32)          # layer input, (N, fin_pads[0])
        for l in range(num_layer):                    # static unroll: layers fused
            lay = layout[l]
            fin = fin_pads[l]
            H = h0_ref[l].astype(jnp.float32)         # (N, Hd)
            bias = w_ref[lay['bias']:lay['bias'] + 1, :]          # (1, 3Hd)

            # One (N, 3Hd) accumulator holds [R | Z | Hcand_x] pre-activations.
            pre = dconv_acc(None, cur, lay['x'], fin)     # X-side, fused 3 gates
            pre = dconv_acc(pre, H, lay['hzr'], Hd)       # H-side Z/R (Hc lanes zero)
            pre = pre + bias                              # broadcast bias row

            R = jax.nn.sigmoid(pre[:, :Hd])               # lane-aligned with H
            Z = jax.nn.sigmoid(pre[:, Hd:2 * Hd])         # off critical path

            # Candidate: X-side part already sits in pre[:, 2Hd:]; add the
            # H*R diffusion (candidate weights live in lanes 0:Hd of their blocks,
            # so accC[:, :Hd] is a shift-free prefix slice, aligned with H).
            accC = dconv_acc(None, H * R, lay['hc'], Hd)
            H_tilde = jnp.tanh(pre[:, 2 * Hd:] + accC[:, :Hd])

            H_new = Z * H + (1.0 - Z) * H_tilde
            out_ref[l] = H_new.astype(out_ref.dtype)      # per-layer store
            cur = H_new

    return kernel


def _full_spec(shape):
    nd = len(shape)
    return pl.BlockSpec(shape, lambda i, _nd=nd: (0,) * _nd)


# ------------------------------ glue / model ------------------------------- #

def build_diffusion_matrices(adj):
    """P_fwd = D_out^{-1} A,  P_bwd = D_in^{-1} A^T  (degrees clamped at 1)."""
    deg_out = jnp.maximum(adj.sum(axis=1), 1.0)
    deg_in = jnp.maximum(adj.sum(axis=0), 1.0)
    p_fwd = adj / deg_out[:, None]
    p_bwd = adj.T / deg_in[:, None]
    return p_fwd, p_bwd


def _pack_weights(layer_params, fin_pads, hidden_dim, K):
    """Pack ALL layers' gate weights + biases into one (rows, 3*Hd) f32 slab.

    Column order is [R | Z | Hcand]; H-side Z/R blocks are zero-padded in the
    Hcand lanes, candidate blocks carry their weight in lanes 0:Hd.  Every
    block occupies a multiple-of-8 row count so all slab offsets stay
    sublane-aligned.  Returns (slab, per-layer row-offset layout).
    """
    Hd = hidden_dim
    W3 = 3 * Hd
    rows_list = []
    layout = []
    row = 0

    def add_block(mat):
        nonlocal row
        start = row
        rows_list.append(mat.astype(jnp.float32))
        row += mat.shape[0]
        return start

    for l, params in enumerate(layer_params):
        wz, bz, wr, br, wh, bh = params
        fin_raw = wz.shape[2] - Hd
        fin_pad = fin_pads[l]
        lay = {}

        # ---- X-side fused [R|Z|Hcand] blocks (fin_pad rows each) ----
        def xmat(d, k):
            m = jnp.concatenate([wr[d, k, :fin_raw, :],
                                 wz[d, k, :fin_raw, :],
                                 wh[d, k, :fin_raw, :]], axis=1)     # (fin, 3Hd)
            if fin_pad > fin_raw:
                m = jnp.concatenate(
                    [m, jnp.zeros((fin_pad - fin_raw, W3), jnp.float32)], axis=0)
            return m

        xs = [add_block(xmat(0, 0) + xmat(1, 0))]      # T_0 identical for both dirs
        for k in range(1, K):
            xs.append(add_block(xmat(0, k)))
            xs.append(add_block(xmat(1, k)))
        lay['x'] = xs

        # ---- H-side Z/R blocks, zero-padded to 3Hd wide ----
        def hzrmat(d, k):
            return jnp.concatenate([wr[d, k, fin_raw:, :],
                                    wz[d, k, fin_raw:, :],
                                    jnp.zeros((Hd, Hd), jnp.float32)], axis=1)

        hz = [add_block(hzrmat(0, 0) + hzrmat(1, 0))]
        for k in range(1, K):
            hz.append(add_block(hzrmat(0, k)))
            hz.append(add_block(hzrmat(1, k)))
        lay['hzr'] = hz

        # ---- H-side candidate blocks (weight in lanes 0:Hd) ----
        def hcmat(d, k):
            return jnp.concatenate([wh[d, k, fin_raw:, :],
                                    jnp.zeros((Hd, 2 * Hd), jnp.float32)], axis=1)

        hc = [add_block(hcmat(0, 0) + hcmat(1, 0))]
        for k in range(1, K):
            hc.append(add_block(hcmat(0, k)))
            hc.append(add_block(hcmat(1, k)))
        lay['hc'] = hc

        # ---- fused bias row [bR | bZ | bH], padded to 8 rows ----
        brow = jnp.concatenate([br, bz, bh], axis=1)                  # (1, 3Hd)
        brow = jnp.concatenate([brow, jnp.zeros((7, W3), jnp.float32)], axis=0)
        lay['bias'] = add_block(brow)

        layout.append(lay)

    slab = jnp.concatenate(rows_list, axis=0)
    return slab, layout


def dcrnn_forward(x, edge_index, layer_params, hidden_state=None,
                  weight_matrix=None, *, num_nodes, hidden_dim, K):
    """Mirrors DCRNN.forward: stacked DCGRU layers, returns stacked hiddens."""
    assert K >= 1
    # Dense adjacency from (edge_index, edge_weight) -- glue, not the hot path.
    src, dst = edge_index[0], edge_index[1]
    w = weight_matrix if weight_matrix is not None else jnp.ones(src.shape, jnp.float32)
    adj = jnp.zeros((num_nodes, num_nodes), jnp.float32).at[src, dst].add(w)
    p_fwd, p_bwd = build_diffusion_matrices(adj)
    pdiff = jnp.stack([p_fwd, p_bwd])                      # (2, N, N) single operand

    num_layer = len(layer_params)
    if hidden_state is None:
        h0 = jnp.zeros((num_layer, num_nodes, hidden_dim), jnp.float32)
    else:
        h0 = jnp.asarray(hidden_state, jnp.float32)

    # Pad layer-0 feature width to a multiple of 8 so slab blocks are aligned.
    fin0 = x.shape[1]
    fin0_pad = max(8, ((fin0 + 7) // 8) * 8)
    if fin0_pad > fin0:
        x_in = jnp.concatenate(
            [x.astype(jnp.float32),
             jnp.zeros((num_nodes, fin0_pad - fin0), jnp.float32)], axis=1)
    else:
        x_in = x.astype(jnp.float32)
    fin_pads = [fin0_pad] + [hidden_dim] * (num_layer - 1)

    wslab, layout = _pack_weights(layer_params, fin_pads, hidden_dim, K)

    kernel = _make_dcrnn_kernel(num_layer, K, hidden_dim, fin_pads, layout)
    args = (x_in, h0, pdiff, wslab)                        # 4 input refs total
    out = pl.pallas_call(
        kernel,
        grid=(1,),
        in_specs=[_full_spec(a.shape) for a in args],
        out_specs=_full_spec((num_layer, num_nodes, hidden_dim)),
        out_shape=jax.ShapeDtypeStruct((num_layer, num_nodes, hidden_dim),
                                       jnp.float32),
        compiler_params=pltpu.CompilerParams(
            dimension_semantics=("arbitrary",)),
    )(*args)
    return out                                             # already (L, N, Hd)


def init_layer_params(key, in_channels, hidden_dim, K):
    """Deterministic glorot-ish init for the 3 gates of one DCGRU layer."""
    cin = in_channels + hidden_dim
    keys = jax.random.split(key, 6)
    scale = 1.0 / jnp.sqrt(jnp.float32(cin))

    def w(k):
        return scale * jax.random.uniform(k, (2, K, cin, hidden_dim),
                                          jnp.float32, -1.0, 1.0)

    def b(k):
        return 0.1 * jax.random.uniform(k, (1, hidden_dim), jnp.float32, -1.0, 1.0)

    return (w(keys[0]), b(keys[1]),   # z gate
            w(keys[2]), b(keys[3]),   # r gate
            w(keys[4]), b(keys[5]))   # h gate


# --------------------------- pure-JAX reference ----------------------------- #

_HI = jax.lax.Precision.HIGHEST


def _mm(a, b):
    return jnp.dot(a, b, precision=_HI)


def _dconv_ref(C, Pf, Pb, W, b, K):
    acc = _mm(C, W[0, 0]) + _mm(C, W[1, 0])
    if K > 1:
        tf1, tb1 = _mm(Pf, C), _mm(Pb, C)
        acc = acc + _mm(tf1, W[0, 1]) + _mm(tb1, W[1, 1])
        tf0 = tb0 = C
        for k in range(2, K):
            tf2 = 2.0 * _mm(Pf, tf1) - tf0
            tb2 = 2.0 * _mm(Pb, tb1) - tb0
            acc = acc + _mm(tf2, W[0, k]) + _mm(tb2, W[1, k])
            tf0, tf1 = tf1, tf2
            tb0, tb1 = tb1, tb2
    return acc + b


def dcrnn_forward_ref(x, adj, layer_params, hidden_dim, K, hidden_state=None):
    Pf, Pb = build_diffusion_matrices(adj)
    output, outs = x, []
    for l, params in enumerate(layer_params):
        wz, bz, wr, br, wh, bh = params
        if hidden_state is None:
            H = jnp.zeros((x.shape[0], hidden_dim), jnp.float32)
        else:
            H = hidden_state[l]
        CZ = jnp.concatenate([output, H], axis=1)
        Z = jax.nn.sigmoid(_dconv_ref(CZ, Pf, Pb, wz, bz, K))
        R = jax.nn.sigmoid(_dconv_ref(CZ, Pf, Pb, wr, br, K))
        CH = jnp.concatenate([output, H * R], axis=1)
        Ht = jnp.tanh(_dconv_ref(CH, Pf, Pb, wh, bh, K))
        output = Z * H + (1.0 - Z) * Ht
        outs.append(output)
    return jnp.stack(outs)


# ---------------------------------- main ------------------------------------ #

if __name__ == "__main__":
    def run_case(num_nodes, emb_dim, hidden_dim, num_layer, K, seed, use_hidden):
        key = jax.random.PRNGKey(seed)
        kx, kw, kp, kh = jax.random.split(key, 4)

        # Node features X: (N, embedding_dim)
        x = jax.random.normal(kx, (num_nodes, emb_dim), jnp.float32)

        # Deterministic sparse directed graph: ring + skip-3 edges.
        nodes = jnp.arange(num_nodes, dtype=jnp.int32)
        src = jnp.concatenate([nodes, nodes])
        dst = jnp.concatenate([(nodes + 1) % num_nodes, (nodes + 3) % num_nodes])
        edge_index = jnp.stack([src, dst])                         # (2, E)
        edge_weight = jax.random.uniform(kw, (edge_index.shape[1],),
                                         jnp.float32, 0.1, 1.0)    # weight_matrix

        # Per-layer params (layer 0: in = embedding_dim, others: in = hidden_dim).
        layer_keys = jax.random.split(kp, num_layer)
        layer_params = []
        for ln in range(num_layer):
            in_ch = emb_dim if ln == 0 else hidden_dim
            layer_params.append(init_layer_params(layer_keys[ln], in_ch,
                                                  hidden_dim, K))

        hidden_state = None
        if use_hidden:
            hidden_state = jax.random.normal(
                kh, (num_layer, num_nodes, hidden_dim), jnp.float32)

        out = dcrnn_forward(x, edge_index, layer_params,
                            hidden_state=hidden_state, weight_matrix=edge_weight,
                            num_nodes=num_nodes, hidden_dim=hidden_dim, K=K)
        out = jax.block_until_ready(out)
        assert out.shape == (num_layer, num_nodes, hidden_dim), out.shape

        # Cross-check against the f32 precision=HIGHEST pure-JAX reference.
        adj = jnp.zeros((num_nodes, num_nodes),
                        jnp.float32).at[src, dst].add(edge_weight)
        ref = dcrnn_forward_ref(x, adj, layer_params, hidden_dim, K,
                                hidden_state=hidden_state)
        err = float(jnp.max(jnp.abs(out - ref)))
        assert jnp.allclose(out, ref, atol=1e-4, rtol=1e-4), err
        return err

    # Primary config (mirrors the module config): embedding 4, hidden 32,
    # 2 layers, diffusion_k = 2, zero-initialized hidden state.
    run_case(num_nodes=16, emb_dim=4, hidden_dim=32, num_layer=2, K=2,
             seed=0, use_hidden=False)
    # Provided-hidden-state path (previously untested correctness concern).
    run_case(num_nodes=16, emb_dim=4, hidden_dim=32, num_layer=2, K=2,
             seed=2, use_hidden=True)
    # K>=3 Chebyshev recursion with 3 fused layers.
    run_case(num_nodes=16, emb_dim=4, hidden_dim=32, num_layer=3, K=3,
             seed=1, use_hidden=False)

    print("KERNEL_OK")
</pallas_src>

<mosaic_0001>
module attributes {stable_mosaic.version = 11 : i64} {
  func.func @kernel(%arg0: i32, %arg1: memref<16x8xf32, #tpu.memory_space<vmem>>, %arg2: memref<2x16x32xf32, #tpu.memory_space<vmem>>, %arg3: memref<2x16x16xf32, #tpu.memory_space<vmem>>, %arg4: memref<520x96xf32, #tpu.memory_space<vmem>>, %arg5: memref<2x16x32xf32, #tpu.memory_space<vmem>>) attributes {dimension_semantics = [#tpu.dimension_semantics<arbitrary>], iteration_bounds = array<i64: 1>, scalar_prefetch = 0 : i64, scratch_operands = 0 : i64, tpu.core_type = #tpu.core_type<tc>, window_params = [{pipeline_mode = #tpu.pipeline_mode<synchronous>, transform_indices = @transform_0, window_bounds = array<i64: 16, 8>}, {pipeline_mode = #tpu.pipeline_mode<synchronous>, transform_indices = @transform_1, window_bounds = array<i64: 2, 16, 32>}, {pipeline_mode = #tpu.pipeline_mode<synchronous>, transform_indices = @transform_2, window_bounds = array<i64: 2, 16, 16>}, {pipeline_mode = #tpu.pipeline_mode<synchronous>, transform_indices = @transform_3, window_bounds = array<i64: 520, 96>}, {pipeline_mode = #tpu.pipeline_mode<synchronous>, transform_indices = @transform_4, window_bounds = array<i64: 2, 16, 32>}]} {
    %c0 = arith.constant 0 : index
    %c0_0 = arith.constant 0 : index
    %c0_1 = arith.constant 0 : index
    %0 = vector.load %arg3[%c0, %c0_0, %c0_1] : memref<2x16x16xf32, #tpu.memory_space<vmem>>, vector<1x16x16xf32>
    %1 = vector.shape_cast %0 : vector<1x16x16xf32> to vector<16x16xf32>
    %c1 = arith.constant 1 : index
    %c0_2 = arith.constant 0 : index
    %c0_3 = arith.constant 0 : index
    %2 = vector.load %arg3[%c1, %c0_2, %c0_3] : memref<2x16x16xf32, #tpu.memory_space<vmem>>, vector<1x16x16xf32>
    %3 = vector.shape_cast %2 : vector<1x16x16xf32> to vector<16x16xf32>
    %c0_4 = arith.constant 0 : index
    %c0_5 = arith.constant 0 : index
    %4 = vector.load %arg1[%c0_4, %c0_5] : memref<16x8xf32, #tpu.memory_space<vmem>>, vector<16x8xf32>
    %c0_6 = arith.constant 0 : index
    %c0_7 = arith.constant 0 : index
    %c0_8 = arith.constant 0 : index
    %5 = vector.load %arg2[%c0_6, %c0_7, %c0_8] : memref<2x16x32xf32, #tpu.memory_space<vmem>>, vector<1x16x32xf32>
    %6 = vector.shape_cast %5 : vector<1x16x32xf32> to vector<16x32xf32>
    %c216 = arith.constant 216 : index
    %c0_9 = arith.constant 0 : index
    %7 = vector.load %arg4[%c216, %c0_9] : memref<520x96xf32, #tpu.memory_space<vmem>>, vector<1x96xf32>
    %c0_10 = arith.constant 0 : index
    %c0_11 = arith.constant 0 : index
    %8 = vector.load %arg4[%c0_10, %c0_11] : memref<520x96xf32, #tpu.memory_space<vmem>>, vector<8x96xf32>
    %cst = arith.constant dense<0.000000e+00> : vector<16x96xf32>
    %9 = tpu.matmul %4, %8, %cst {dimension_numbers = #tpu.dot_dimension_numbers<[1], [0], [0], [1], [0, 0, 1, 1], [], []>} : vector<16x8xf32>, vector<8x96xf32>, vector<16x96xf32> -> vector<16x96xf32>
    %cst_12 = arith.constant dense<0.000000e+00> : vector<16x8xf32>
    %10 = tpu.matmul %1, %4, %cst_12 {dimension_numbers = #tpu.dot_dimension_numbers<[1], [0], [0], [1], [0, 0, 1, 1], [], []>} : vector<16x16xf32>, vector<16x8xf32>, vector<16x8xf32> -> vector<16x8xf32>
    %cst_13 = arith.constant dense<0.000000e+00> : vector<16x8xf32>
    %11 = tpu.matmul %3, %4, %cst_13 {dimension_numbers = #tpu.dot_dimension_numbers<[1], [0], [0], [1], [0, 0, 1, 1], [], []>} : vector<16x16xf32>, vector<16x8xf32>, vector<16x8xf32> -> vector<16x8xf32>
    %c8 = arith.constant 8 : index
    %c0_14 = arith.constant 0 : index
    %12 = vector.load %arg4[%c8, %c0_14] : memref<520x96xf32, #tpu.memory_space<vmem>>, vector<8x96xf32>
    %cst_15 = arith.constant dense<0.000000e+00> : vector<16x96xf32>
    %13 = tpu.matmul %10, %12, %cst_15 {dimension_numbers = #tpu.dot_dimension_numbers<[1], [0], [0], [1], [0, 0, 1, 1], [], []>} : vector<16x8xf32>, vector<8x96xf32>, vector<16x96xf32> -> vector<16x96xf32>
    %14 = arith.addf %9, %13 : vector<16x96xf32>
    %c16 = arith.constant 16 : index
    %c0_16 = arith.constant 0 : index
    %15 = vector.load %arg4[%c16, %c0_16] : memref<520x96xf32, #tpu.memory_space<vmem>>, vector<8x96xf32>
    %cst_17 = arith.constant dense<0.000000e+00> : vector<16x96xf32>
    %16 = tpu.matmul %11, %15, %cst_17 {dimension_numbers = #tpu.dot_dimension_numbers<[1], [0], [0], [1], [0, 0, 1, 1], [], []>} : vector<16x8xf32>, vector<8x96xf32>, vector<16x96xf32> -> vector<16x96xf32>
    %17 = arith.addf %14, %16 : vector<16x96xf32>
    %c24 = arith.constant 24 : index
    %c0_18 = arith.constant 0 : index
    %18 = vector.load %arg4[%c24, %c0_18] : memref<520x96xf32, #tpu.memory_space<vmem>>, vector<32x96xf32>
    %cst_19 = arith.constant dense<0.000000e+00> : vector<16x96xf32>
    %19 = tpu.matmul %6, %18, %cst_19 {dimension_numbers = #tpu.dot_dimension_numbers<[1], [0], [0], [1], [0, 0, 1, 1], [], []>} : vector<16x32xf32>, vector<32x96xf32>, vector<16x96xf32> -> vector<16x96xf32>
    %20 = arith.addf %17, %19 : vector<16x96xf32>
    %cst_20 = arith.constant dense<0.000000e+00> : vector<16x32xf32>
    %21 = tpu.matmul %1, %6, %cst_20 {dimension_numbers = #tpu.dot_dimension_numbers<[1], [0], [0], [1], [0, 0, 1, 1], [], []>} : vector<16x16xf32>, vector<16x32xf32>, vector<16x32xf32> -> vector<16x32xf32>
    %cst_21 = arith.constant dense<0.000000e+00> : vector<16x32xf32>
    %22 = tpu.matmul %3, %6, %cst_21 {dimension_numbers = #tpu.dot_dimension_numbers<[1], [0], [0], [1], [0, 0, 1, 1], [], []>} : vector<16x16xf32>, vector<16x32xf32>, vector<16x32xf32> -> vector<16x32xf32>
    %c56 = arith.constant 56 : index
    %c0_22 = arith.constant 0 : index
    %23 = vector.load %arg4[%c56, %c0_22] : memref<520x96xf32, #tpu.memory_space<vmem>>, vector<32x96xf32>
    %cst_23 = arith.constant dense<0.000000e+00> : vector<16x96xf32>
    %24 = tpu.matmul %21, %23, %cst_23 {dimension_numbers = #tpu.dot_dimension_numbers<[1], [0], [0], [1], [0, 0, 1, 1], [], []>} : vector<16x32xf32>, vector<32x96xf32>, vector<16x96xf32> -> vector<16x96xf32>
    %25 = arith.addf %20, %24 : vector<16x96xf32>
    %c88 = arith.constant 88 : index
    %c0_24 = arith.constant 0 : index
    %26 = vector.load %arg4[%c88, %c0_24] : memref<520x96xf32, #tpu.memory_space<vmem>>, vector<32x96xf32>
    %cst_25 = arith.constant dense<0.000000e+00> : vector<16x96xf32>
    %27 = tpu.matmul %22, %26, %cst_25 {dimension_numbers = #tpu.dot_dimension_numbers<[1], [0], [0], [1], [0, 0, 1, 1], [], []>} : vector<16x32xf32>, vector<32x96xf32>, vector<16x96xf32> -> vector<16x96xf32>
    %28 = arith.addf %25, %27 : vector<16x96xf32>
    %29 = vector.broadcast %7 : vector<1x96xf32> to vector<16x96xf32>
    %30 = arith.addf %28, %29 : vector<16x96xf32>
    %31 = vector.extract_strided_slice %30 {offsets = [0, 0], sizes = [16, 32], strides = [1, 1]} : vector<16x96xf32> to vector<16x32xf32>
    %32 = arith.negf %31 : vector<16x32xf32>
    %33 = math.exp %32 : vector<16x32xf32>
    %cst_26 = arith.constant 1.000000e+00 : f32
    %34 = vector.broadcast %cst_26 : f32 to vector<16x32xf32>
    %35 = arith.addf %34, %33 : vector<16x32xf32>
    %36 = arith.divf %34, %35 : vector<16x32xf32>
    %37 = vector.extract_strided_slice %30 {offsets = [0, 32], sizes = [16, 32], strides = [1, 1]} : vector<16x96xf32> to vector<16x32xf32>
    %38 = arith.negf %37 : vector<16x32xf32>
    %39 = math.exp %38 : vector<16x32xf32>
    %cst_27 = arith.constant 1.000000e+00 : f32
    %40 = vector.broadcast %cst_27 : f32 to vector<16x32xf32>
    %41 = arith.addf %40, %39 : vector<16x32xf32>
    %42 = arith.divf %40, %41 : vector<16x32xf32>
    %43 = arith.mulf %6, %36 : vector<16x32xf32>
    %c120 = arith.constant 120 : index
    %c0_28 = arith.constant 0 : index
    %44 = vector.load %arg4[%c120, %c0_28] : memref<520x96xf32, #tpu.memory_space<vmem>>, vector<32x96xf32>
    %cst_29 = arith.constant dense<0.000000e+00> : vector<16x96xf32>
    %45 = tpu.matmul %43, %44, %cst_29 {dimension_numbers = #tpu.dot_dimension_numbers<[1], [0], [0], [1], [0, 0, 1, 1], [], []>} : vector<16x32xf32>, vector<32x96xf32>, vector<16x96xf32> -> vector<16x96xf32>
    %cst_30 = arith.constant dense<0.000000e+00> : vector<16x32xf32>
    %46 = tpu.matmul %1, %43, %cst_30 {dimension_numbers = #tpu.dot_dimension_numbers<[1], [0], [0], [1], [0, 0, 1, 1], [], []>} : vector<16x16xf32>, vector<16x32xf32>, vector<16x32xf32> -> vector<16x32xf32>
    %cst_31 = arith.constant dense<0.000000e+00> : vector<16x32xf32>
    %47 = tpu.matmul %3, %43, %cst_31 {dimension_numbers = #tpu.dot_dimension_numbers<[1], [0], [0], [1], [0, 0, 1, 1], [], []>} : vector<16x16xf32>, vector<16x32xf32>, vector<16x32xf32> -> vector<16x32xf32>
    %c152 = arith.constant 152 : index
    %c0_32 = arith.constant 0 : index
    %48 = vector.load %arg4[%c152, %c0_32] : memref<520x96xf32, #tpu.memory_space<vmem>>, vector<32x96xf32>
    %cst_33 = arith.constant dense<0.000000e+00> : vector<16x96xf32>
    %49 = tpu.matmul %46, %48, %cst_33 {dimension_numbers = #tpu.dot_dimension_numbers<[1], [0], [0], [1], [0, 0, 1, 1], [], []>} : vector<16x32xf32>, vector<32x96xf32>, vector<16x96xf32> -> vector<16x96xf32>
    %50 = arith.addf %45, %49 : vector<16x96xf32>
    %c184 = arith.constant 184 : index
    %c0_34 = arith.constant 0 : index
    %51 = vector.load %arg4[%c184, %c0_34] : memref<520x96xf32, #tpu.memory_space<vmem>>, vector<32x96xf32>
    %cst_35 = arith.constant dense<0.000000e+00> : vector<16x96xf32>
    %52 = tpu.matmul %47, %51, %cst_35 {dimension_numbers = #tpu.dot_dimension_numbers<[1], [0], [0], [1], [0, 0, 1, 1], [], []>} : vector<16x32xf32>, vector<32x96xf32>, vector<16x96xf32> -> vector<16x96xf32>
    %53 = arith.addf %50, %52 : vector<16x96xf32>
    %54 = vector.extract_strided_slice %30 {offsets = [0, 64], sizes = [16, 32], strides = [1, 1]} : vector<16x96xf32> to vector<16x32xf32>
    %55 = vector.extract_strided_slice %53 {offsets = [0, 0], sizes = [16, 32], strides = [1, 1]} : vector<16x96xf32> to vector<16x32xf32>
    %56 = arith.addf %54, %55 : vector<16x32xf32>
    %57 = math.tanh %56 : vector<16x32xf32>
    %58 = arith.mulf %42, %6 : vector<16x32xf32>
    %cst_36 = arith.constant 1.000000e+00 : f32
    %59 = vector.broadcast %cst_36 : f32 to vector<16x32xf32>
    %60 = arith.subf %59, %42 : vector<16x32xf32>
    %61 = arith.mulf %60, %57 : vector<16x32xf32>
    %62 = arith.addf %58, %61 : vector<16x32xf32>
    %c0_37 = arith.constant 0 : index
    %c0_38 = arith.constant 0 : index
    %c0_39 = arith.constant 0 : index
    %63 = vector.load %arg5[%c0_37, %c0_38, %c0_39] : memref<2x16x32xf32, #tpu.memory_space<vmem>>, vector<1x16x32xf32>
    %64 = vector.shape_cast %63 : vector<1x16x32xf32> to vector<16x32xf32>
    %65 = vector.shape_cast %62 : vector<16x32xf32> to vector<1x16x32xf32>
    tpu.vector_store %arg5[%c0_37, %c0_38, %c0_39], %65 {strides = array<i32>} : memref<2x16x32xf32, #tpu.memory_space<vmem>>, vector<1x16x32xf32>,
    %c1_40 = arith.constant 1 : index
    %c0_41 = arith.constant 0 : index
    %c0_42 = arith.constant 0 : index
    %66 = vector.load %arg2[%c1_40, %c0_41, %c0_42] : memref<2x16x32xf32, #tpu.memory_space<vmem>>, vector<1x16x32xf32>
    %67 = vector.shape_cast %66 : vector<1x16x32xf32> to vector<16x32xf32>
    %c512 = arith.constant 512 : index
    %c0_43 = arith.constant 0 : index
    %68 = vector.load %arg4[%c512, %c0_43] : memref<520x96xf32, #tpu.memory_space<vmem>>, vector<1x96xf32>
    %c224 = arith.constant 224 : index
    %c0_44 = arith.constant 0 : index
    %69 = vector.load %arg4[%c224, %c0_44] : memref<520x96xf32, #tpu.memory_space<vmem>>, vector<32x96xf32>
    %cst_45 = arith.constant dense<0.000000e+00> : vector<16x96xf32>
    %70 = tpu.matmul %62, %69, %cst_45 {dimension_numbers = #tpu.dot_dimension_numbers<[1], [0], [0], [1], [0, 0, 1, 1], [], []>} : vector<16x32xf32>, vector<32x96xf32>, vector<16x96xf32> -> vector<16x96xf32>
    %cst_46 = arith.constant dense<0.000000e+00> : vector<16x32xf32>
    %71 = tpu.matmul %1, %62, %cst_46 {dimension_numbers = #tpu.dot_dimension_numbers<[1], [0], [0], [1], [0, 0, 1, 1], [], []>} : vector<16x16xf32>, vector<16x32xf32>, vector<16x32xf32> -> vector<16x32xf32>
    %cst_47 = arith.constant dense<0.000000e+00> : vector<16x32xf32>
    %72 = tpu.matmul %3, %62, %cst_47 {dimension_numbers = #tpu.dot_dimension_numbers<[1], [0], [0], [1], [0, 0, 1, 1], [], []>} : vector<16x16xf32>, vector<16x32xf32>, vector<16x32xf32> -> vector<16x32xf32>
    %c256 = arith.constant 256 : index
    %c0_48 = arith.constant 0 : index
    %73 = vector.load %arg4[%c256, %c0_48] : memref<520x96xf32, #tpu.memory_space<vmem>>, vector<32x96xf32>
    %cst_49 = arith.constant dense<0.000000e+00> : vector<16x96xf32>
    %74 = tpu.matmul %71, %73, %cst_49 {dimension_numbers = #tpu.dot_dimension_numbers<[1], [0], [0], [1], [0, 0, 1, 1], [], []>} : vector<16x32xf32>, vector<32x96xf32>, vector<16x96xf32> -> vector<16x96xf32>
    %75 = arith.addf %70, %74 : vector<16x96xf32>
    %c288 = arith.constant 288 : index
    %c0_50 = arith.constant 0 : index
    %76 = vector.load %arg4[%c288, %c0_50] : memref<520x96xf32, #tpu.memory_space<vmem>>, vector<32x96xf32>
    %cst_51 = arith.constant dense<0.000000e+00> : vector<16x96xf32>
    %77 = tpu.matmul %72, %76, %cst_51 {dimension_numbers = #tpu.dot_dimension_numbers<[1], [0], [0], [1], [0, 0, 1, 1], [], []>} : vector<16x32xf32>, vector<32x96xf32>, vector<16x96xf32> -> vector<16x96xf32>
    %78 = arith.addf %75, %77 : vector<16x96xf32>
    %c320 = arith.constant 320 : index
    %c0_52 = arith.constant 0 : index
    %79 = vector.load %arg4[%c320, %c0_52] : memref<520x96xf32, #tpu.memory_space<vmem>>, vector<32x96xf32>
    %cst_53 = arith.constant dense<0.000000e+00> : vector<16x96xf32>
    %80 = tpu.matmul %67, %79, %cst_53 {dimension_numbers = #tpu.dot_dimension_numbers<[1], [0], [0], [1], [0, 0, 1, 1], [], []>} : vector<16x32xf32>, vector<32x96xf32>, vector<16x96xf32> -> vector<16x96xf32>
    %81 = arith.addf %78, %80 : vector<16x96xf32>
    %cst_54 = arith.constant dense<0.000000e+00> : vector<16x32xf32>
    %82 = tpu.matmul %1, %67, %cst_54 {dimension_numbers = #tpu.dot_dimension_numbers<[1], [0], [0], [1], [0, 0, 1, 1], [], []>} : vector<16x16xf32>, vector<16x32xf32>, vector<16x32xf32> -> vector<16x32xf32>
    %cst_55 = arith.constant dense<0.000000e+00> : vector<16x32xf32>
    %83 = tpu.matmul %3, %67, %cst_55 {dimension_numbers = #tpu.dot_dimension_numbers<[1], [0], [0], [1], [0, 0, 1, 1], [], []>} : vector<16x16xf32>, vector<16x32xf32>, vector<16x32xf32> -> vector<16x32xf32>
    %c352 = arith.constant 352 : index
    %c0_56 = arith.constant 0 : index
    %84 = vector.load %arg4[%c352, %c0_56] : memref<520x96xf32, #tpu.memory_space<vmem>>, vector<32x96xf32>
    %cst_57 = arith.constant dense<0.000000e+00> : vector<16x96xf32>
    %85 = tpu.matmul %82, %84, %cst_57 {dimension_numbers = #tpu.dot_dimension_numbers<[1], [0], [0], [1], [0, 0, 1, 1], [], []>} : vector<16x32xf32>, vector<32x96xf32>, vector<16x96xf32> -> vector<16x96xf32>
    %86 = arith.addf %81, %85 : vector<16x96xf32>
    %c384 = arith.constant 384 : index
    %c0_58 = arith.constant 0 : index
    %87 = vector.load %arg4[%c384, %c0_58] : memref<520x96xf32, #tpu.memory_space<vmem>>, vector<32x96xf32>
    %cst_59 = arith.constant dense<0.000000e+00> : vector<16x96xf32>
    %88 = tpu.matmul %83, %87, %cst_59 {dimension_numbers = #tpu.dot_dimension_numbers<[1], [0], [0], [1], [0, 0, 1, 1], [], []>} : vector<16x32xf32>, vector<32x96xf32>, vector<16x96xf32> -> vector<16x96xf32>
    %89 = arith.addf %86, %88 : vector<16x96xf32>
    %90 = vector.broadcast %68 : vector<1x96xf32> to vector<16x96xf32>
    %91 = arith.addf %89, %90 : vector<16x96xf32>
    %92 = vector.extract_strided_slice %91 {offsets = [0, 0], sizes = [16, 32], strides = [1, 1]} : vector<16x96xf32> to vector<16x32xf32>
    %93 = arith.negf %92 : vector<16x32xf32>
    %94 = math.exp %93 : vector<16x32xf32>
    %cst_60 = arith.constant 1.000000e+00 : f32
    %95 = vector.broadcast %cst_60 : f32 to vector<16x32xf32>
    %96 = arith.addf %95, %94 : vector<16x32xf32>
    %97 = arith.divf %95, %96 : vector<16x32xf32>
    %98 = vector.extract_strided_slice %91 {offsets = [0, 32], sizes = [16, 32], strides = [1, 1]} : vector<16x96xf32> to vector<16x32xf32>
    %99 = arith.negf %98 : vector<16x32xf32>
    %100 = math.exp %99 : vector<16x32xf32>
    %cst_61 = arith.constant 1.000000e+00 : f32
    %101 = vector.broadcast %cst_61 : f32 to vector<16x32xf32>
    %102 = arith.addf %101, %100 : vector<16x32xf32>
    %103 = arith.divf %101, %102 : vector<16x32xf32>
    %104 = arith.mulf %67, %97 : vector<16x32xf32>
    %c416 = arith.constant 416 : index
    %c0_62 = arith.constant 0 : index
    %105 = vector.load %arg4[%c416, %c0_62] : memref<520x96xf32, #tpu.memory_space<vmem>>, vector<32x96xf32>
    %cst_63 = arith.constant dense<0.000000e+00> : vector<16x96xf32>
    %106 = tpu.matmul %104, %105, %cst_63 {dimension_numbers = #tpu.dot_dimension_numbers<[1], [0], [0], [1], [0, 0, 1, 1], [], []>} : vector<16x32xf32>, vector<32x96xf32>, vector<16x96xf32> -> vector<16x96xf32>
    %cst_64 = arith.constant dense<0.000000e+00> : vector<16x32xf32>
    %107 = tpu.matmul %1, %104, %cst_64 {dimension_numbers = #tpu.dot_dimension_numbers<[1], [0], [0], [1], [0, 0, 1, 1], [], []>} : vector<16x16xf32>, vector<16x32xf32>, vector<16x32xf32> -> vector<16x32xf32>
    %cst_65 = arith.constant dense<0.000000e+00> : vector<16x32xf32>
    %108 = tpu.matmul %3, %104, %cst_65 {dimension_numbers = #tpu.dot_dimension_numbers<[1], [0], [0], [1], [0, 0, 1, 1], [], []>} : vector<16x16xf32>, vector<16x32xf32>, vector<16x32xf32> -> vector<16x32xf32>
    %c448 = arith.constant 448 : index
    %c0_66 = arith.constant 0 : index
    %109 = vector.load %arg4[%c448, %c0_66] : memref<520x96xf32, #tpu.memory_space<vmem>>, vector<32x96xf32>
    %cst_67 = arith.constant dense<0.000000e+00> : vector<16x96xf32>
    %110 = tpu.matmul %107, %109, %cst_67 {dimension_numbers = #tpu.dot_dimension_numbers<[1], [0], [0], [1], [0, 0, 1, 1], [], []>} : vector<16x32xf32>, vector<32x96xf32>, vector<16x96xf32> -> vector<16x96xf32>
    %111 = arith.addf %106, %110 : vector<16x96xf32>
    %c480 = arith.constant 480 : index
    %c0_68 = arith.constant 0 : index
    %112 = vector.load %arg4[%c480, %c0_68] : memref<520x96xf32, #tpu.memory_space<vmem>>, vector<32x96xf32>
    %cst_69 = arith.constant dense<0.000000e+00> : vector<16x96xf32>
    %113 = tpu.matmul %108, %112, %cst_69 {dimension_numbers = #tpu.dot_dimension_numbers<[1], [0], [0], [1], [0, 0, 1, 1], [], []>} : vector<16x32xf32>, vector<32x96xf32>, vector<16x96xf32> -> vector<16x96xf32>
    %114 = arith.addf %111, %113 : vector<16x96xf32>
    %115 = vector.extract_strided_slice %91 {offsets = [0, 64], sizes = [16, 32], strides = [1, 1]} : vector<16x96xf32> to vector<16x32xf32>
    %116 = vector.extract_strided_slice %114 {offsets = [0, 0], sizes = [16, 32], strides = [1, 1]} : vector<16x96xf32> to vector<16x32xf32>
    %117 = arith.addf %115, %116 : vector<16x32xf32>
    %118 = math.tanh %117 : vector<16x32xf32>
    %119 = arith.mulf %103, %67 : vector<16x32xf32>
    %cst_70 = arith.constant 1.000000e+00 : f32
    %120 = vector.broadcast %cst_70 : f32 to vector<16x32xf32>
    %121 = arith.subf %120, %103 : vector<16x32xf32>
    %122 = arith.mulf %121, %118 : vector<16x32xf32>
    %123 = arith.addf %119, %122 : vector<16x32xf32>
    %c1_71 = arith.constant 1 : index
    %c0_72 = arith.constant 0 : index
    %c0_73 = arith.constant 0 : index
    %124 = vector.load %arg5[%c1_71, %c0_72, %c0_73] : memref<2x16x32xf32, #tpu.memory_space<vmem>>, vector<1x16x32xf32>
    %125 = vector.shape_cast %124 : vector<1x16x32xf32> to vector<16x32xf32>
    %126 = vector.shape_cast %123 : vector<16x32xf32> to vector<1x16x32xf32>
    tpu.vector_store %arg5[%c1_71, %c0_72, %c0_73], %126 {strides = array<i32>} : memref<2x16x32xf32, #tpu.memory_space<vmem>>, vector<1x16x32xf32>,
    return
  }
  func.func @transform_0(%arg0: i32) -> (i32, i32) {
    %c0_i32 = arith.constant 0 : i32
    %c0_i32_0 = arith.constant 0 : i32
    %c0_i32_1 = arith.constant 0 : i32
    return %c0_i32, %c0_i32_0 : i32, i32
  }
  func.func @transform_1(%arg0: i32) -> (i32, i32, i32) {
    %c0_i32 = arith.constant 0 : i32
    %c0_i32_0 = arith.constant 0 : i32
    %c0_i32_1 = arith.constant 0 : i32
    %c0_i32_2 = arith.constant 0 : i32
    return %c0_i32, %c0_i32_0, %c0_i32_1 : i32, i32, i32
  }
  func.func @transform_2(%arg0: i32) -> (i32, i32, i32) {
    %c0_i32 = arith.constant 0 : i32
    %c0_i32_0 = arith.constant 0 : i32
    %c0_i32_1 = arith.constant 0 : i32
    %c0_i32_2 = arith.constant 0 : i32
    return %c0_i32, %c0_i32_0, %c0_i32_1 : i32, i32, i32
  }
  func.func @transform_3(%arg0: i32) -> (i32, i32) {
    %c0_i32 = arith.constant 0 : i32
    %c0_i32_0 = arith.constant 0 : i32
    %c0_i32_1 = arith.constant 0 : i32
    return %c0_i32, %c0_i32_0 : i32, i32
  }
  func.func @transform_4(%arg0: i32) -> (i32, i32, i32) {
    %c0_i32 = arith.constant 0 : i32
    %c0_i32_0 = arith.constant 0 : i32
    %c0_i32_1 = arith.constant 0 : i32
    %c0_i32_2 = arith.constant 0 : i32
    return %c0_i32, %c0_i32_0, %c0_i32_1 : i32, i32, i32
  }
}

</mosaic_0001>

<bundles_post_ra>
// kernel: tpu_custom_call.1
= control target key start
LH: loop header
LB: loop body
LE: loop exit
PB: predicated region body
PF: predicated region fallthrough
CT: control target
= control target key end

     0   :  { %vm29_vm0 = vcmask 130048   ;;  %s3802_s0 = inlined_call_operand.vmem [shape: f32[16,8], index: 0, kind: input, shape index: {}]   ;;  %s3803_s1 = inlined_call_operand.vmem [shape: f32[2,16,32], index: 1, kind: input, shape index: {}]   ;;  %s3804_s2 = inlined_call_operand.vmem [shape: f32[2,16,16], index: 2, kind: input, shape index: {}]   ;;  %s3805_s3 = inlined_call_operand.vmem [shape: f32[520,96], index: 3, kind: input, shape index: {}]   ;;  %s3806_s4 = inlined_call_operand.hbm [shape: f32[2,16,32], index: 4, kind: output, shape index: {}]  }
   0x1   :  { %v23_v0 = vld [vmem:[%s3802_s0] sm:$0xff]  ;;  %v24_v1 = vld [vmem:[%s3802_s0 + $0x8] sm:$0xff]  ;;  %v3409_v4 = vld [vmem:[%s3804_s2 + $0x10] sm:$0xff] }
   0x2   :  { %v3402_v2 = vld [vmem:[%s3804_s2] sm:$0xff]  ;;  %v3112_v3 = vpack.c.bf16 %v24_v1, %v23_v0  ;;  %2859 = vmatprep.mubr.msk.f32.mxu1 %vm29_vm0, %v3409_v4  ;;  %v3421_v6 = vld [vmem:[%s3803_s1 + $0x8] sm:$0xff] }
   0x3   :  { %2852 = vmatprep.mubr.msk.f32.mxu0 %vm29_vm0, %v3402_v2  ;;  %v3416_v5 = vld [vmem:[%s3803_s1] sm:$0xff]  ;;  %v192_v7 = vld [vmem:[%s3805_s3 + $0x8] sm:$0xff] }
   0x4   :  { %3113 = vmatprep.subr.bf16.mxu0 %v3112_v3  ;;  %3117 = vmatprep.subr.bf16.mxu1 %v3112_v3  ;;  %v3128_v8 = vpack.c.bf16 %v3421_v6, %v3416_v5 }
   0x5   :  { %9 = vsyncpa [#allocation3], 0  ;;  %3115 = vmatpush3.bf16.msra.mxu0 %v3112_v3  ;;  %v3431_v9 = vld [vmem:[%s3804_s2 + $0x8] sm:$0xff]  ;;  %3119 = vmatpush3.bf16.msra.mxu1 %v3112_v3  ;;  %v3436_v10 = vld [vmem:[%s3804_s2 + $0x18] sm:$0xff]  ;;  %s3362_s7 = smov 32   ;;  %vm193_vm1 = vcmask 64512  }
   0x6   :  { %3129 = vmatprep.subr.bf16.mxu1 %v3128_v8  ;;  %2862 = vmatprep.subr.mxu0 %v192_v7  ;;  %v28_v11 = vld [vmem:[%s3805_s3] sm:$0xff]  ;;  %v356_v16 = vld [vmem:[%s3805_s3 + $0x10] sm:$0xff]  ;;  %v440_v19 = vld [vmem:[%s3805_s3 + $0x18] sm:$0xff]  ;;  %vm444_vm2 = vcmask 261120   ;;  %s3363_s2 = smov 64   ;;  %s3364_s6 = smov 96  }
   0x7   :  { %1291 = vrot.lane.b32.xlu1 %v3416_v5, %s3362_s7  ;;  %v441_v20 = vld [vmem:[%s3805_s3 + $0x20] sm:$0xff]  ;;  %v442_v24 = vld [vmem:[%s3805_s3 + $0x28] sm:$0xff]  ;;  %v443_v25 = vld [vmem:[%s3805_s3 + $0x30] sm:$0xff] }
   0x8   :  { %2853 = vmatmul.mubr.msk.f32.vlgmr.msra.gmra.mrb[0].mxu0 %vm29_vm0, %v3431_v9  ;;  %2860 = vmatmul.mubr.msk.f32.vlgmr.msra.gmra.mrb[0].mxu1 %vm29_vm0, %v3436_v10  ;;  %v3120_v22 = vpack.c.bf16 %v441_v20, %v440_v19  ;;  %v3124_v26 = vpack.c.bf16 %v443_v25, %v442_v24  ;;  %v678_v27 = vld [vmem:[%s3805_s3 + $0x38] sm:$0xff]  ;;  %v679_v28 = vld [vmem:[%s3805_s3 + $0x40] sm:$0xff]  ;;  %v680_v30 = vld [vmem:[%s3805_s3 + $0x48] sm:$0xff] }
   0x9   :  { %3131 = vmatpush3.bf16.msra.mxu1 %v3128_v8  ;;  %2892 = vmatprep.mubr.msk.f32.mxu1 %vm29_vm0, %v3402_v2  ;;  %v3136_v29 = vpack.c.bf16 %v679_v28, %v678_v27  ;;  %v681_v31 = vld [vmem:[%s3805_s3 + $0x50] sm:$0xff]  ;;  %v765_v33 = vld [vmem:[%s3805_s3 + $0x58] sm:$0xff]  ;;  %v766_v34 = vld [vmem:[%s3805_s3 + $0x60] sm:$0xff] }
   0xa   :  { %3133 = vmatprep.subr.bf16.mxu1 %v3128_v8  ;;  %2863 = vmatpush3.msra.mxu0 %v192_v7  ;;  %v3140_v32 = vpack.c.bf16 %v681_v31, %v680_v30  ;;  %v3144_v35 = vpack.c.bf16 %v766_v34, %v765_v33  ;;  %v767_v36 = vld [vmem:[%s3805_s3 + $0x68] sm:$0xff]  ;;  %v768_v37 = vld [vmem:[%s3805_s3 + $0x70] sm:$0xff]  ;;  %v2653_v39 = vld [vmem:[%s3805_s3 + $0xd8] ss:$0 sm:$0xff] }
   0xb   :  { %2867 = vmatprep.subr.mxu0 %v28_v11  ;;  %1293 = vrot.lane.b32.xlu1 %v3421_v6, %s3362_s7  ;;  %v3148_v38 = vpack.c.bf16 %v768_v37, %v767_v36  ;;  %v1026_v55 = vld [vmem:[%s3805_s3 + $0x98] sm:$0xff]  ;;  %v1027_v56 = vld [vmem:[%s3805_s3 + $0xa0] sm:$0xff]  ;;  %v1028_v58 = vld [vmem:[%s3805_s3 + $0xa8] sm:$0xff] }
   0xc   :  { %2893 = vmatmul.mubr.msk.f32.vlgmr.msra.gmra.mrb[2].mxu1 %vm29_vm0, %v3431_v9  ;;  %v3160_v57 = vpack.c.bf16 %v1027_v56, %v1026_v55  ;;  %v1029_v59 = vld [vmem:[%s3805_s3 + $0xb0] sm:$0xff]  ;;  %v872_v61 = vld [vmem:[%s3805_s3 + $0x78] sm:$0xff]  ;;  %v873_v62 = vld [vmem:[%s3805_s3 + $0x80] sm:$0xff] }
   0xd   :  { %3135 = vmatpush3.bf16.msra.mxu1 %v3128_v8  ;;  %2899 = vmatprep.mubr.msk.f32.mxu1 %vm29_vm0, %v3409_v4  ;;  %v3164_v60 = vpack.c.bf16 %v1029_v59, %v1028_v58  ;;  %v3168_v63 = vpack.c.bf16 %v873_v62, %v872_v61  ;;  %v1192_v7 = vld [vmem:[%s3805_s3 + $0xb8] sm:$0xff]  ;;  %v1193_v8 = vld [vmem:[%s3805_s3 + $0xc0] sm:$0xff]  ;;  %v1647_v61 = vld [vmem:[%s3805_s3 + $0x130] sm:$0xff] }
   0xe   :  { %v1481_v37 = vld [vmem:[%s3805_s3 + $0x100] sm:$0xff]  ;;  %v1648_v62 = vld [vmem:[%s3805_s3 + $0x138] sm:$0xff] }
   0xf   :  { %v1645_v56 = vld [vmem:[%s3805_s3 + $0x120] sm:$0xff] }
  0x10   :  { %2900 = vmatmul.mubr.msk.f32.vlgmr.msra.gmra.mrb[4].mxu1 %vm29_vm0, %v3436_v10 }
  0x11   :  { %2928 = vmatprep.mubr.msk.f32.mxu1 %vm29_vm0, %v3402_v2 }
  0x79   :  { %v1292_v25 = vpop.permute.xlu1 %1291 }
  0x7d   :  { %v1294_v27 = vpop.permute.xlu1 %1293 }
  0xdb   :  { %v2854_v12 = vpop.f32.mrb[0].mxu0  ;;  %v2861_v13 = vpop.f32.mrb[0].mxu1 }
  0xdc   :  { %v102_v14 = vpop.f32.mrb[1].mxu0  ;;  %v183_v15 = vpop.f32.mrb[1].mxu1 }
  0xdd   :  { %2864 = vmatprep.mubr.msk.f32.mxu0 %vm193_vm1, %v102_v14  ;;  %v1194_v14 = vld [vmem:[%s3805_s3 + $0xc8] sm:$0xff] }
  0xde   :  { %2865 = vmatmul.mubr.msk.f32.vlgmr.msra.gmra.mrb[2].mxu0 %vm193_vm1, %v2854_v12  ;;  %v3176_v12 = vpack.c.bf16 %v1193_v8, %v1192_v7 }
  0xdf   :  { %2868 = vmatpush3.msra.mxu0 %v28_v11  ;;  %2869 = vmatprep.mubr.msk.f32.mxu0 %vm193_vm1, %v23_v0  ;;  %v2894_v17 = vpop.f32.mrb[2].mxu1  ;;  %v874_v0 = vld [vmem:[%s3805_s3 + $0x88] sm:$0xff] }
  0xe0   :  { %2872 = vmatprep.subr.mxu0 %v356_v16  ;;  %v594_v18 = vpop.f32.mrb[3].mxu1 }
  0xe3   :  { %v2901_v21 = vpop.f32.mrb[4].mxu1 }
  0xe4   :  { %v669_v23 = vpop.f32.mrb[5].mxu1 }
  0xe6   :  { %2870 = vmatmul.mubr.msk.f32.vlgmr.msra.gmra.mrb[2].mxu0 %vm193_vm1, %v24_v1  ;;  %v875_v1 = vld [vmem:[%s3805_s3 + $0x90] sm:$0xff] }
  0xe7   :  { %2873 = vmatpush3.msra.mxu0 %v356_v16  ;;  %2874 = vmatprep.mubr.msk.f32.mxu0 %vm193_vm1, %v183_v15  ;;  %v1195_v15 = vld [vmem:[%s3805_s3 + $0xd0] sm:$0xff] }
  0xe8   :  { %3121 = vmatprep.subr.bf16.mxu0 %v3120_v22  ;;  %v3180_v16 = vpack.c.bf16 %v1195_v15, %v1194_v14  ;;  %v1969_v14 = vld [vmem:[%s3805_s3 + $0x160] sm:$0xff]  ;;  %v1970_v15 = vld [vmem:[%s3805_s3 + $0x168] sm:$0xff] }
  0xee   :  { %2875 = vmatmul.mubr.msk.f32.vlgmr.msra.gmra.mrb[2].mxu0 %vm193_vm1, %v2861_v13 }
  0xef   :  { %3123 = vmatpush3.bf16.msra.mxu0 %v3120_v22  ;;  %2885 = vmatprep.mubr.msk.f32.mxu0 %vm444_vm2, %v3416_v5 }
  0xf0   :  { %3125 = vmatprep.subr.bf16.mxu0 %v3124_v26 }
  0xf3   :  { %3127 = vmatpush3.bf16.msra.mxu0 %v3124_v26 }
  0xf4   :  { %3137 = vmatprep.subr.bf16.mxu0 %v3136_v29 }
  0xf6   :  { %2886 = vmatmul.mubr.msk.f32.vlgmr.msra.gmra.mrb[2].mxu0 %vm444_vm2, %v3421_v6 }
  0xf7   :  { %3139 = vmatpush3.bf16.msra.mxu0 %v3136_v29  ;;  %2910 = vmatprep.mubr.msk.f32.mxu0 %vm444_vm2, %v594_v18 }
  0xf8   :  { %3141 = vmatprep.subr.bf16.mxu0 %v3140_v32 }
  0xfb   :  { %3143 = vmatpush3.bf16.msra.mxu0 %v3140_v32 }
  0xfc   :  { %3145 = vmatprep.subr.bf16.mxu0 %v3144_v35 }
  0xfe   :  { %2911 = vmatmul.mubr.msk.f32.vlgmr.msra.gmra.mrb[2].mxu0 %vm444_vm2, %v2894_v17 }
  0xff   :  { %3147 = vmatpush3.bf16.msra.mxu0 %v3144_v35  ;;  %2921 = vmatprep.mubr.msk.f32.mxu0 %vm444_vm2, %v669_v23 }
 0x100   :  { %3149 = vmatprep.subr.bf16.mxu0 %v3148_v38 }
 0x103   :  { %3151 = vmatpush3.bf16.msra.mxu0 %v3148_v38  ;;  %v1482_v38 = vld [vmem:[%s3805_s3 + $0x108] sm:$0xff] }
 0x106   :  { %2922 = vmatmul.mubr.msk.f32.vlgmr.msra.gmra.mrb[2].mxu0 %vm444_vm2, %v2901_v21 }
 0x107   :  { %2975 = vmatprep.mubr.msk.f32.mxu0 %vm29_vm0, %v3402_v2 }
 0x1d9   :  { %v2923_v40 = vpop.f32.mrb[2].mxu0 }
 0x1da   :  { %v3517_v41 = vadd.f32 %v2923_v40, %v2653_v39  ;;  %v841_v42 = vpop.f32.mrb[3].mxu0  ;;  %v3192_v40 = vpack.c.bf16 %v1482_v38, %v1481_v37 }
 0x1db   :  { %v3519_v43 = vadd.f32 %v2653_v39, %v841_v42  ;;  %v1483_v39 = vld [vmem:[%s3805_s3 + $0x110] sm:$0xff] }
 0x1dc   :  { %v2655_v44 = vmul.f32 -1.442695, %v3517_v41 }
 0x1dd   :  { %v2654_v45 = vmul.f32 -1.442695, %v3519_v43 }
 0x1de   :  { %3314 = vpow2.f32 %v2655_v44 }
 0x1df   :  { %3316 = vpow2.f32 %v2654_v45 }
 0x1e8   :  { %v3315_v46 = vpop.eup %3314 }
 0x1e9   :  { %v3317_v47 = vpop.eup %3316  ;;  %v865_v48 = vadd.f32 1.0, %v3315_v46  ;;  %v3608_v46 = vld [vmem:[%s3803_s1 + $0x10] sm:$0xff] }
 0x1ea   :  { %v864_v49 = vadd.f32 1.0, %v3317_v47  ;;  %v3613_v47 = vld [vmem:[%s3803_s1 + $0x18] sm:$0xff] }
 0x1eb   :  { %3318 = vrcp.f32 %v865_v48  ;;  %v3224_v48 = vpack.c.bf16 %v3613_v47, %v3608_v46 }
 0x1ec   :  { %3320 = vrcp.f32 %v864_v49  ;;  %v1327_v49 = vld [vmem:[%s3805_s3 + $0xe0] sm:$0xff] }
 0x1f5   :  { %v3523_v50 = vpop.eup %3318 }
 0x1f6   :  { %v3525_v51 = vpop.eup %3320  ;;  %v871_v52 = vmul.f32 %v3523_v50, %v3421_v6  ;;  %v3172_v6 = vpack.c.bf16 %v875_v1, %v874_v0  ;;  %v1300_v32 = vsub.f32 1.0, %v3523_v50  ;;  %v1298_v34 = vmul.f32 %v3523_v50, %v1294_v27  ;;  %v1328_v50 = vld [vmem:[%s3805_s3 + $0xe8] sm:$0xff] }
 0x1f7   :  { %v870_v53 = vmul.f32 %v3525_v51, %v3416_v5  ;;  %v1299_v26 = vsub.f32 1.0, %v3525_v51  ;;  %v1297_v29 = vmul.f32 %v3525_v51, %v1292_v25  ;;  %v3200_v51 = vpack.c.bf16 %v1328_v50, %v1327_v49  ;;  %v2163_v50 = vld [vmem:[%s3805_s3 + $0x1a0] sm:$0xff] }
 0x1f8   :  { %v3212_v0 = vpack.c.bf16 %v1648_v62, %v1647_v61 }
 0x1f9   :  { %v3152_v54 = vpack.c.bf16 %v871_v52, %v870_v53 }
 0x1fb   :  { %3153 = vmatprep.subr.bf16.mxu1 %v3152_v54 }
 0x1fc   :  { %3155 = vmatpush3.bf16.msra.mxu1 %v3152_v54 }
 0x1fd   :  { %3157 = vmatprep.subr.bf16.mxu1 %v3152_v54 }
 0x1ff   :  { %2929 = vmatmul.mubr.msk.f32.vlgmr.msra.gmra.mrb[6].mxu1 %vm29_vm0, %v3431_v9 }
 0x200   :  { %3159 = vmatpush3.bf16.msra.mxu1 %v3152_v54  ;;  %2935 = vmatprep.mubr.msk.f32.mxu1 %vm29_vm0, %v3409_v4 }
 0x201   :  { %3161 = vmatprep.subr.bf16.mxu1 %v3160_v57 }
 0x203   :  { %2936 = vmatmul.mubr.msk.f32.vlgmr.msra.gmra.mrb[8].mxu1 %vm29_vm0, %v3436_v10 }
 0x204   :  { %3163 = vmatpush3.bf16.msra.mxu1 %v3160_v57  ;;  %v1646_v57 = vld [vmem:[%s3805_s3 + $0x128] sm:$0xff] }
 0x205   :  { %3165 = vmatprep.subr.bf16.mxu1 %v3164_v60  ;;  %v3208_v59 = vpack.c.bf16 %v1646_v57, %v1645_v56 }
 0x208   :  { %3167 = vmatpush3.bf16.msra.mxu1 %v3164_v60 }
 0x209   :  { %3169 = vmatprep.subr.bf16.mxu1 %v3168_v63 }
 0x2d2   :  { %v2930_v3 = vpop.f32.mrb[6].mxu1 }
 0x2d3   :  { %v942_v5 = vpop.f32.mrb[7].mxu1 }
 0x2d4   :  { %2946 = vmatprep.mubr.msk.f32.mxu1 %vm444_vm2, %v942_v5  ;;  %v1733_v5 = vld [vmem:[%s3805_s3 + $0x148] sm:$0xff] }
 0x2d5   :  { %2947 = vmatmul.mubr.msk.f32.vlgmr.msra.gmra.mrb[10].mxu1 %vm444_vm2, %v2930_v3  ;;  %v1732_v3 = vld [vmem:[%s3805_s3 + $0x140] sm:$0xff] }
 0x2d6   :  { %3171 = vmatpush3.bf16.msra.mxu1 %v3168_v63  ;;  %2957 = vmatprep.mubr.msk.f32.mxu1 %vm444_vm2, %v870_v53  ;;  %v2937_v11 = vpop.f32.mrb[8].mxu1  ;;  %v1330_v53 = vld [vmem:[%s3805_s3 + $0xf8] sm:$0xff]  ;;  %v3216_v7 = vpack.c.bf16 %v1733_v5, %v1732_v3 }
 0x2d7   :  { %3173 = vmatprep.subr.bf16.mxu1 %v3172_v6  ;;  %v1017_v13 = vpop.f32.mrb[9].mxu1 }
 0x2da   :  { %3175 = vmatpush3.bf16.msra.mxu1 %v3172_v6 }
 0x2db   :  { %3177 = vmatprep.subr.bf16.mxu1 %v3176_v12 }
 0x2dd   :  { %2958 = vmatmul.mubr.msk.f32.vlgmr.msra.gmra.mrb[10].mxu1 %vm444_vm2, %v871_v52  ;;  %v1329_v52 = vld [vmem:[%s3805_s3 + $0xf0] sm:$0xff] }
 0x2de   :  { %3179 = vmatpush3.bf16.msra.mxu1 %v3176_v12  ;;  %2968 = vmatprep.mubr.msk.f32.mxu1 %vm444_vm2, %v1017_v13  ;;  %v3204_v55 = vpack.c.bf16 %v1330_v53, %v1329_v52  ;;  %v1735_v12 = vld [vmem:[%s3805_s3 + $0x158] sm:$0xff] }
 0x2df   :  { %3181 = vmatprep.subr.bf16.mxu1 %v3180_v16 }
 0x2e2   :  { %3183 = vmatpush3.bf16.msra.mxu1 %v3180_v16  ;;  %v3232_v16 = vpack.c.bf16 %v1970_v15, %v1969_v14 }
 0x2e3   :  { %3193 = vmatprep.subr.bf16.mxu1 %v3192_v40 }
 0x2e5   :  { %2969 = vmatmul.mubr.msk.f32.vlgmr.msra.gmra.mrb[10].mxu1 %vm444_vm2, %v2937_v11  ;;  %v1734_v11 = vld [vmem:[%s3805_s3 + $0x150] sm:$0xff] }
 0x2e6   :  { %3195 = vmatpush3.bf16.msra.mxu1 %v3192_v40  ;;  %v3220_v13 = vpack.c.bf16 %v1735_v12, %v1734_v11 }
 0x3b8   :  { %v2970_v17 = vpop.f32.mrb[10].mxu1 }
 0x3b9   :  { %v1268_v18 = vpop.f32.mrb[11].mxu1 }
 0x3ba   :  { %1281 = vrot.lane.b32.xlu0 %v1268_v18, %s3363_s2  ;;  %v1972_v18 = vld [vmem:[%s3805_s3 + $0x178] sm:$0xff] }
 0x3be   :  { %1283 = vrot.lane.b32.xlu0 %v2970_v17, %s3363_s2  ;;  %v1971_v17 = vld [vmem:[%s3805_s3 + $0x170] sm:$0xff] }
 0x42c   :  { %v1282_v19 = vpop.permute.xlu0 %1281 }
 0x42d   :  { %v1287_v20 = vadd.f32 %v1282_v19, %v3519_v43  ;;  %v3236_v19 = vpack.c.bf16 %v1972_v18, %v1971_v17 }
 0x42f   :  { %3322 = vtanh.f32 %v1287_v20  ;;  %v2056_v20 = vld [vmem:[%s3805_s3 + $0x180] sm:$0xff] }
 0x430   :  { %v1284_v21 = vpop.permute.xlu0 %1283 }
 0x431   :  { %v1288_v22 = vadd.f32 %v1284_v21, %v3517_v41  ;;  %v1484_v41 = vld [vmem:[%s3805_s3 + $0x118] sm:$0xff]  ;;  %v2057_v21 = vld [vmem:[%s3805_s3 + $0x188] sm:$0xff] }
 0x432   :  { %v3196_v42 = vpack.c.bf16 %v1484_v41, %v1483_v39 }
 0x433   :  { %3324 = vtanh.f32 %v1288_v22  ;;  %v3240_v22 = vpack.c.bf16 %v2057_v21, %v2056_v20 }
 0x434   :  { %3197 = vmatprep.subr.bf16.mxu1 %v3196_v42 }
 0x435   :  { %3199 = vmatpush3.bf16.msra.mxu1 %v3196_v42  ;;  %v2317_v42 = vld [vmem:[%s3805_s3 + $0x1c0] sm:$0xff] }
 0x436   :  { %3201 = vmatprep.subr.bf16.mxu1 %v3200_v51 }
 0x439   :  { %v3323_v23 = vpop.eup %3322 }
 0x43a   :  { %1303 = vrot.lane.b32.xlu0 %v3323_v23, %s3364_s6  ;;  %v2058_v23 = vld [vmem:[%s3805_s3 + $0x190] sm:$0xff] }
 0x43d   :  { %v3325_v24 = vpop.eup %3324 }
 0x43e   :  { %1305 = vrot.lane.b32.xlu1 %v3325_v24, %s3364_s6  ;;  %v2059_v24 = vld [vmem:[%s3805_s3 + $0x198] sm:$0xff] }
 0x43f   :  { %v3244_v25 = vpack.c.bf16 %v2059_v24, %v2058_v23 }
 0x4ac   :  { %v1304_v28 = vpop.permute.xlu0 %1303 }
 0x4ad   :  { %v1309_v30 = vmul.f32 %v1304_v28, %v1299_v26  ;;  %v2688_v26 = vld [vmem:[%s3805_s3 + $0x200] ss:$0 sm:$0xff] }
 0x4af   :  { %v1311_v31 = vadd.f32 %v1309_v30, %v1297_v29 }
 0x4b0   :  { %v1306_v33 = vpop.permute.xlu1 %1305 }
 0x4b1   :  { %v1310_v35 = vmul.f32 %v1306_v33, %v1300_v32  ;;  %1315 = vrot.lane.b32.xlu0 %v1311_v31, %s3364_s6 }
 0x4b3   :  { %v1312_v36 = vadd.f32 %v1310_v35, %v1298_v34 }
 0x4b5   :  { %1317 = vrot.lane.b32.xlu1 %v1312_v36, %s3364_s6 }
 0x523   :  { %v1316_v43 = vpop.permute.xlu0 %1315 }
 0x524   :  { %1321 = vst.msk [vmem:[#allocation2] sm:$0xff] %vm444_vm2, %v1316_v43 }
 0x527   :  { %v1318_v44 = vpop.permute.xlu1 %1317 }
 0x528   :  { %1322 = vst.msk [vmem:[#allocation2 + $0x8] sm:$0xff] %vm444_vm2, %v1318_v44  ;;  %v3184_v45 = vpack.c.bf16 %v1318_v44, %v1316_v43 }
 0x52a   :  { %3185 = vmatprep.subr.bf16.mxu0 %v3184_v45 }
 0x52b   :  { %3187 = vmatpush3.bf16.msra.mxu0 %v3184_v45 }
 0x52c   :  { %3189 = vmatprep.subr.bf16.mxu0 %v3184_v45 }
 0x52e   :  { %2976 = vmatmul.mubr.msk.f32.vlgmr.msra.gmra.mrb[4].mxu0 %vm29_vm0, %v3431_v9 }
 0x52f   :  { %3191 = vmatpush3.bf16.msra.mxu0 %v3184_v45  ;;  %2982 = vmatprep.mubr.msk.f32.mxu0 %vm29_vm0, %v3409_v4  ;;  %v2319_v45 = vld [vmem:[%s3805_s3 + $0x1d0] sm:$0xff] }
 0x530   :  { %3225 = vmatprep.subr.bf16.mxu0 %v3224_v48 }
 0x532   :  { %2983 = vmatmul.mubr.msk.f32.vlgmr.msra.gmra.mrb[6].mxu0 %vm29_vm0, %v3436_v10 }
 0x533   :  { %3227 = vmatpush3.bf16.msra.mxu0 %v3224_v48  ;;  %3033 = vmatprep.mubr.msk.f32.mxu0 %vm29_vm0, %v3402_v2 }
 0x534   :  { %3229 = vmatprep.subr.bf16.mxu0 %v3224_v48 }
 0x536   :  { %3034 = vmatmul.mubr.msk.f32.vlgmr.msra.gmra.mrb[8].mxu0 %vm29_vm0, %v3431_v9 }
 0x537   :  { %3231 = vmatpush3.bf16.msra.mxu0 %v3224_v48  ;;  %3040 = vmatprep.mubr.msk.f32.mxu0 %vm29_vm0, %v3409_v4  ;;  %v2320_v48 = vld [vmem:[%s3805_s3 + $0x1d8] sm:$0xff] }
 0x538   :  { %v3260_v49 = vpack.c.bf16 %v2320_v48, %v2319_v45 }
 0x53a   :  { %3041 = vmatmul.mubr.msk.f32.vlgmr.msra.gmra.mrb[10].mxu0 %vm29_vm0, %v3436_v10 }
 0x53b   :  { %3069 = vmatprep.mubr.msk.f32.mxu0 %vm29_vm0, %v3402_v2 }
 0x601   :  { %v2977_v54 = vpop.f32.mrb[4].mxu0 }
 0x602   :  { %v1397_v2 = vpop.f32.mrb[5].mxu0 }
 0x603   :  { %2993 = vmatprep.mubr.msk.f32.mxu1 %vm444_vm2, %v1397_v2  ;;  %v2483_v2 = vld [vmem:[%s3805_s3 + $0x1e0] sm:$0xff] }
 0x604   :  { %2994 = vmatmul.mubr.msk.f32.vlgmr.msra.gmra.mrb[12].mxu1 %vm444_vm2, %v2977_v54 }
 0x605   :  { %3203 = vmatpush3.bf16.msra.mxu1 %v3200_v51  ;;  %3004 = vmatprep.mubr.msk.f32.mxu1 %vm444_vm2, %v1316_v43  ;;  %v2984_v58 = vpop.f32.mrb[6].mxu0  ;;  %v2318_v43 = vld [vmem:[%s3805_s3 + $0x1c8] sm:$0xff] }
 0x606   :  { %3205 = vmatprep.subr.bf16.mxu1 %v3204_v55  ;;  %v1472_v60 = vpop.f32.mrb[7].mxu0 }
 0x609   :  { %3207 = vmatpush3.bf16.msra.mxu1 %v3204_v55  ;;  %v3035_v63 = vpop.f32.mrb[8].mxu0  ;;  %v2484_v55 = vld [vmem:[%s3805_s3 + $0x1e8] sm:$0xff] }
 0x60a   :  { %3209 = vmatprep.subr.bf16.mxu1 %v3208_v59  ;;  %v1885_v1 = vpop.f32.mrb[9].mxu0  ;;  %v3272_v57 = vpack.c.bf16 %v2484_v55, %v2483_v2 }
 0x60c   :  { %3005 = vmatmul.mubr.msk.f32.vlgmr.msra.gmra.mrb[12].mxu1 %vm444_vm2, %v1318_v44  ;;  %v3256_v44 = vpack.c.bf16 %v2318_v43, %v2317_v42 }
 0x60d   :  { %3211 = vmatpush3.bf16.msra.mxu1 %v3208_v59  ;;  %3015 = vmatprep.mubr.msk.f32.mxu1 %vm444_vm2, %v1472_v60  ;;  %v3042_v6 = vpop.f32.mrb[10].mxu0  ;;  %v2485_v59 = vld [vmem:[%s3805_s3 + $0x1f0] sm:$0xff]  ;;  %v2486_v60 = vld [vmem:[%s3805_s3 + $0x1f8] sm:$0xff] }
 0x60e   :  { %3213 = vmatprep.subr.bf16.mxu1 %v3212_v0  ;;  %v1960_v8 = vpop.f32.mrb[11].mxu0  ;;  %v3276_v61 = vpack.c.bf16 %v2486_v60, %v2485_v59 }
 0x611   :  { %3215 = vmatpush3.bf16.msra.mxu1 %v3212_v0 }
 0x612   :  { %3217 = vmatprep.subr.bf16.mxu1 %v3216_v7 }
 0x614   :  { %3016 = vmatmul.mubr.msk.f32.vlgmr.msra.gmra.mrb[12].mxu1 %vm444_vm2, %v2984_v58 }
 0x615   :  { %3219 = vmatpush3.bf16.msra.mxu1 %v3216_v7  ;;  %3026 = vmatprep.mubr.msk.f32.mxu1 %vm444_vm2, %v3608_v46 }
 0x616   :  { %3221 = vmatprep.subr.bf16.mxu1 %v3220_v13 }
 0x619   :  { %3223 = vmatpush3.bf16.msra.mxu1 %v3220_v13 }
 0x61a   :  { %3233 = vmatprep.subr.bf16.mxu1 %v3232_v16 }
 0x61c   :  { %3027 = vmatmul.mubr.msk.f32.vlgmr.msra.gmra.mrb[12].mxu1 %vm444_vm2, %v3613_v47 }
 0x61d   :  { %3235 = vmatpush3.bf16.msra.mxu1 %v3232_v16  ;;  %3051 = vmatprep.mubr.msk.f32.mxu1 %vm444_vm2, %v1885_v1 }
 0x61e   :  { %3237 = vmatprep.subr.bf16.mxu1 %v3236_v19 }
 0x621   :  { %3239 = vmatpush3.bf16.msra.mxu1 %v3236_v19 }
 0x622   :  { %3241 = vmatprep.subr.bf16.mxu1 %v3240_v22 }
 0x624   :  { %3052 = vmatmul.mubr.msk.f32.vlgmr.msra.gmra.mrb[12].mxu1 %vm444_vm2, %v3035_v63 }
 0x625   :  { %3243 = vmatpush3.bf16.msra.mxu1 %v3240_v22  ;;  %3062 = vmatprep.mubr.msk.f32.mxu1 %vm444_vm2, %v1960_v8 }
 0x626   :  { %3245 = vmatprep.subr.bf16.mxu1 %v3244_v25 }
 0x629   :  { %3247 = vmatpush3.bf16.msra.mxu1 %v3244_v25 }
 0x62c   :  { %3063 = vmatmul.mubr.msk.f32.vlgmr.msra.gmra.mrb[12].mxu1 %vm444_vm2, %v3042_v6 }
 0x6ff   :  { %v3064_v27 = vpop.f32.mrb[12].mxu1 }
 0x700   :  { %v3710_v28 = vadd.f32 %v3064_v27, %v2688_v26  ;;  %v2132_v29 = vpop.f32.mrb[13].mxu1 }
 0x701   :  { %v3712_v30 = vadd.f32 %v2688_v26, %v2132_v29 }
 0x702   :  { %v2690_v31 = vmul.f32 -1.442695, %v3710_v28 }
 0x703   :  { %v2689_v32 = vmul.f32 -1.442695, %v3712_v30 }
 0x704   :  { %3326 = vpow2.f32 %v2690_v31 }
 0x705   :  { %3328 = vpow2.f32 %v2689_v32 }
 0x70e   :  { %v3327_v33 = vpop.eup %3326 }
 0x70f   :  { %v3329_v34 = vpop.eup %3328  ;;  %v2156_v35 = vadd.f32 1.0, %v3327_v33 }
 0x710   :  { %v2155_v36 = vadd.f32 1.0, %v3329_v34 }
 0x711   :  { %3330 = vrcp.f32 %v2156_v35 }
 0x712   :  { %3332 = vrcp.f32 %v2155_v36 }
 0x71b   :  { %v3716_v37 = vpop.eup %3330 }
 0x71c   :  { %v3718_v38 = vpop.eup %3332  ;;  %v2162_v39 = vmul.f32 %v3716_v37, %v3613_v47 }
 0x71d   :  { %v2161_v40 = vmul.f32 %v3718_v38, %v3608_v46 }
 0x71f   :  { %v3248_v41 = vpack.c.bf16 %v2162_v39, %v2161_v40 }
 0x721   :  { %3249 = vmatprep.subr.bf16.mxu0 %v3248_v41 }
 0x722   :  { %3251 = vmatpush3.bf16.msra.mxu0 %v3248_v41 }
 0x723   :  { %3253 = vmatprep.subr.bf16.mxu0 %v3248_v41 }
 0x725   :  { %3070 = vmatmul.mubr.msk.f32.vlgmr.msra.gmra.mrb[12].mxu0 %vm29_vm0, %v3431_v9  ;;  %v2164_v9 = vld [vmem:[%s3805_s3 + $0x1a8] sm:$0xff] }
 0x726   :  { %3255 = vmatpush3.bf16.msra.mxu0 %v3248_v41  ;;  %3076 = vmatprep.mubr.msk.f32.mxu0 %vm29_vm0, %v3409_v4  ;;  %v3264_v51 = vpack.c.bf16 %v2164_v9, %v2163_v50  ;;  %v2165_v4 = vld [vmem:[%s3805_s3 + $0x1b0] sm:$0xff] }
 0x727   :  { %3257 = vmatprep.subr.bf16.mxu0 %v3256_v44 }
 0x729   :  { %3077 = vmatmul.mubr.msk.f32.vlgmr.msra.gmra.mrb[14].mxu0 %vm29_vm0, %v3436_v10  ;;  %v2166_v10 = vld [vmem:[%s3805_s3 + $0x1b8] sm:$0xff]  ;;  %s3365_s3 = smov [#allocation2]  }
 0x72a   :  { %3259 = vmatpush3.bf16.msra.mxu0 %v3256_v44  ;;  %v3268_v54 = vpack.c.bf16 %v2166_v10, %v2165_v4 }
 0x72b   :  { %3261 = vmatprep.subr.bf16.mxu0 %v3260_v49 }
 0x72e   :  { %3263 = vmatpush3.bf16.msra.mxu0 %v3260_v49 }
 0x72f   :  { %3265 = vmatprep.subr.bf16.mxu0 %v3264_v51 }
 0x7f8   :  { %v3071_v52 = vpop.f32.mrb[12].mxu0 }
 0x7f9   :  { %v2233_v53 = vpop.f32.mrb[13].mxu0 }
 0x7fa   :  { %3087 = vmatprep.mubr.msk.f32.mxu0 %vm444_vm2, %v2233_v53 }
 0x7fb   :  { %3088 = vmatmul.mubr.msk.f32.vlgmr.msra.gmra.mrb[16].mxu0 %vm444_vm2, %v3071_v52 }
 0x7fc   :  { %3267 = vmatpush3.bf16.msra.mxu0 %v3264_v51  ;;  %3098 = vmatprep.mubr.msk.f32.mxu0 %vm444_vm2, %v2161_v40  ;;  %v3078_v56 = vpop.f32.mrb[14].mxu0 }
 0x7fd   :  { %3269 = vmatprep.subr.bf16.mxu0 %v3268_v54  ;;  %v2308_v58 = vpop.f32.mrb[15].mxu0 }
 0x800   :  { %3271 = vmatpush3.bf16.msra.mxu0 %v3268_v54 }
 0x801   :  { %3273 = vmatprep.subr.bf16.mxu0 %v3272_v57 }
 0x803   :  { %3099 = vmatmul.mubr.msk.f32.vlgmr.msra.gmra.mrb[16].mxu0 %vm444_vm2, %v2162_v39 }
 0x804   :  { %3275 = vmatpush3.bf16.msra.mxu0 %v3272_v57  ;;  %3109 = vmatprep.mubr.msk.f32.mxu0 %vm444_vm2, %v2308_v58 }
 0x805   :  { %3277 = vmatprep.subr.bf16.mxu0 %v3276_v61 }
 0x808   :  { %3279 = vmatpush3.bf16.msra.mxu0 %v3276_v61 }
 0x80b   :  { %3110 = vmatmul.mubr.msk.f32.vlgmr.msra.gmra.mrb[16].mxu0 %vm444_vm2, %v3078_v56 }
 0x8de   :  { %v3111_v62 = vpop.f32.mrb[16].mxu0 }
 0x8df   :  { %2574 = vrot.lane.b32.xlu1 %v3111_v62, %s3363_s2  ;;  %v2559_v63 = vpop.f32.mrb[17].mxu0 }
 0x8e0   :  { %2572 = vrot.lane.b32.xlu0 %v2559_v63, %s3363_s2 }
 0x8e3   :  { %2584 = vrot.lane.b32.xlu1 %v3613_v47, %s3362_s7  ;;  %v2591_v47 = vsub.f32 1.0, %v3716_v37 }
 0x8e4   :  { %2582 = vrot.lane.b32.xlu0 %v3608_v46, %s3362_s7  ;;  %v2590_v46 = vsub.f32 1.0, %v3718_v38  ;;  %s2620_s7 = sshll.u32 %s3365_s3, 4  ;;  %s2621_s7 = int_to_ptr.vmem [resolvable:$true] %s2620_s7 }
 0x8e5   :  { %s3338_s2 = scalar_lea.vmem %s2621_s7, 512  ;;  %p3343_p1 = scmp.lt.s32.totalorder %s2621_s7, %s2621_s7 }
 0x8e6   :  { %p3339_p0 = scmp.ne.s32.totalorder %s2621_s7, %s3338_s2  ;;  %p3344_p2 = scmp.lt.s32.totalorder %s3338_s2, %s3338_s2 }
 0x8e8   :  { %p3345_p3 = por %p3344_p2, %p3343_p1 }
 0x8ea   :  { %p3346_p4 = pnand %p3345_p3, %p3339_p0 }
 0x951   :  { %v2575_v0 = vpop.permute.xlu1 %2574 }
 0x952   :  { %v2579_v1 = vadd.f32 %v2575_v0, %v3710_v28  ;;  %v2573_v3 = vpop.permute.xlu0 %2572 }
 0x953   :  { %v2578_v5 = vadd.f32 %v2573_v3, %v3712_v30 }
 0x954   :  { %3334 = vtanh.f32 %v2579_v1 }
 0x955   :  { %3336 = vtanh.f32 %v2578_v5  ;;  %v2585_v8 = vpop.permute.xlu1 %2584 }
 0x956   :  { %v2583_v11 = vpop.permute.xlu0 %2582  ;;  %v2589_v13 = vmul.f32 %v3716_v37, %v2585_v8 }
 0x957   :  { %v2588_v16 = vmul.f32 %v3718_v38, %v2583_v11 }
 0x95e   :  { %v3335_v6 = vpop.eup %3334 }
 0x95f   :  { %v3337_v7 = vpop.eup %3336  ;;  %2596 = vrot.lane.b32.xlu1 %v3335_v6, %s3364_s6 }
 0x960   :  { %2594 = vrot.lane.b32.xlu0 %v3337_v7, %s3364_s6 }
 0x9d1   :  { %v2597_v12 = vpop.permute.xlu1 %2596 }
 0x9d2   :  { %v2601_v14 = vmul.f32 %v2597_v12, %v2591_v47  ;;  %v2595_v15 = vpop.permute.xlu0 %2594 }
 0x9d3   :  { %v2600_v17 = vmul.f32 %v2595_v15, %v2590_v46 }
 0x9d4   :  { %v2603_v18 = vadd.f32 %v2601_v14, %v2589_v13 }
 0x9d5   :  { %v2602_v19 = vadd.f32 %v2600_v17, %v2588_v16 }
 0x9d6   :  { %2608 = vrot.lane.b32.xlu1 %v2603_v18, %s3364_s6 }
 0x9d7   :  { %2606 = vrot.lane.b32.xlu0 %v2602_v19, %s3364_s6 }
 0xa48   :  { %v2609_v20 = vpop.permute.xlu1 %2608 }
 0xa49   :  { %2614 = vst.msk [vmem:[#allocation2 + $0x18] sm:$0xff] %vm444_vm2, %v2609_v20  ;;  %v2607_v21 = vpop.permute.xlu0 %2606 }
 0xa4a   :  { %2613 = vst.msk [vmem:[#allocation2 + $0x10] sm:$0xff] %vm444_vm2, %v2607_v21 }
 0xa4b   :  { %3349 = shalt.err (!%p3346_p4)
}
 0xa4c   :  { %s3350_s6 = scalar_lea.hbm %s3806_s4, 512 }
 0xa4d   :  { %p3351_p5 = scmp.ne.s32.totalorder %s3806_s4, %s3350_s6  ;;  %p3354_p6 = scmp.lt.u32.totalorder %s3350_s6, %s3806_s4 }
 0xa4f   :  { %p3356_p7 = pnand %p3354_p6, %p3351_p5 }
 0xa51   :  { %3359 = shalt.err (!%p3356_p7)
}
 0xa52   :  { %s3366_s14 = smov 128   ;;  %s3367_s15 = smov 8  }
 0xa53   :  { %2626 = dma.vmem_to_hbm [thread:$0]  %s2621_s7, 512, %s3806_s4, [#allocation3], %s3366_s14, %s3366_s14, %s3367_s15  }
 0xa54   :  { %3360 = dma.done.wait [#allocation3], 512  }
 0xa55   :  { %3361 = vsyncadd [#allocation3], 4294966784 }
 0xa56   :  { %2630 = vsyncpa [#allocation3], 1 }

</bundles_post_ra>
